<compile_context>
chip_gen: v7x
topology: tpu7x:2x2x1
jax: 0.10.0
libtpu: 0.0.40
codegen_flags: <defaults>
</compile_context>

<pallas_src>
import functools

import jax
import jax.numpy as jnp
from jax.experimental import pallas as pl
from jax.experimental.pallas import tpu as pltpu


def _kernel(x_ref, w1_ref, b1_ref, w2_ref, b2_ref, o_ref):
    # x_ref:  (TB, H)    tile of input rows (unpadded feature dim)
    # w1_ref: (H, H)     lin1 weight, [in, out], resident
    # b1_ref: (1, H)     lin1 bias, resident
    # w2_ref: (H, Cp)    lin2 weight, [in, out], class axis zero-padded to 128
    # b2_ref: (1, Cp)    lin2 bias, padded class lanes pre-set to -1e30
    # o_ref:  (TB, Cp)   log-probabilities (padded lanes sliced off by wrapper)
    x = x_ref[...]

    # lin1 + relu
    h = jnp.dot(x, w1_ref[...], preferred_element_type=jnp.float32) + b1_ref[...]
    h = jnp.maximum(h, 0.0)

    # F.dropout(p=0.1, training=False) is identity at inference.

    # lin2 (padded class lanes: 0-weight columns + (-1e30) bias -> logits=-1e30)
    logits = jnp.dot(h, w2_ref[...], preferred_element_type=jnp.float32) + b2_ref[...]

    # Numerically-stable log_softmax over dim=1 (class axis).  Padded lanes sit
    # at -1e30, so exp(s) there is 0 and they never affect max / logsumexp.
    m = jnp.max(logits, axis=-1, keepdims=True)
    s = logits - m
    lse = jnp.log(jnp.sum(jnp.exp(s), axis=-1, keepdims=True))
    o_ref[...] = (s - lse).astype(o_ref.dtype)


def _round_up(v: int, m: int) -> int:
    return ((v + m - 1) // m) * m


def _cdiv(a: int, b: int) -> int:
    return (a + b - 1) // b


def prepare_params(w1, b1, w2, b2):
    """One-time parameter prep (call at model init, NOT per forward).

    - lin1 weight/bias kept unpadded (Mosaic pads in VMEM).
    - lin2 weight padded along the class axis to a multiple of 128 with zeros.
    - lin2 bias padded class lanes set to -1e30 so padded logits never win the
      softmax max / contribute to the logsumexp.
    """
    H = w1.shape[0]
    C = w2.shape[1]
    Cp = max(_round_up(C, 128), 128)
    f32 = jnp.float32
    w1p = w1.astype(f32)
    b1p = b1.reshape(1, H).astype(f32)
    w2p = jnp.zeros((H, Cp), f32).at[:, :C].set(w2.astype(f32))
    b2p = jnp.full((1, Cp), -1e30, f32).at[:, :C].set(b2.reshape(1, C).astype(f32))
    return w1p, b1p, w2p, b2p


def _choose_batch_tile(B: int, block_b: int) -> int:
    """Balanced batch tile: large, but bounds padding waste to < one tile and
    guarantees >= 2 grid steps (megacore sharding on v7x) for non-tiny batches."""
    num_steps = max(1, _cdiv(B, block_b))
    if B >= 16:
        num_steps = max(num_steps, 2)
    return max(_round_up(_cdiv(B, num_steps), 8), 8)


@functools.partial(jax.jit, static_argnames=("n_class", "block_b"))
def mlp_classifier(x, w1, b1, w2p, b2p, *, n_class, block_b=1024):
    """x: [B, H]; w1: [H, H] ([in,out]); b1: [1, H]; w2p: [H, Cp]; b2p: [1, Cp]."""
    B, H = x.shape
    Cp = w2p.shape[1]
    C = n_class

    tb = _choose_batch_tile(B, block_b)
    Bp = _round_up(B, tb)

    xb = x.astype(jnp.float32)
    if Bp != B:
        # Minimal zero-row pad so the grid divides evenly (only last tile,
        # extra rows are sliced off below).  Never inflates the feature dim.
        xb = jnp.pad(xb, ((0, Bp - B), (0, 0)))

    grid = (Bp // tb,)

    cost = pl.CostEstimate(
        flops=2 * B * H * (H + C),
        transcendentals=B * C,  # exp in the softmax
        bytes_accessed=4 * (B * H + H * H + H + H * C + C + B * C),
    )

    out_padded = pl.pallas_call(
        _kernel,
        out_shape=jax.ShapeDtypeStruct((Bp, Cp), jnp.float32),
        grid_spec=pltpu.PrefetchScalarGridSpec(
            num_scalar_prefetch=0,
            grid=grid,
            in_specs=[
                pl.BlockSpec((tb, H), lambda i: (i, 0)),   # x rows (tiled over batch)
                pl.BlockSpec((H, H), lambda i: (0, 0)),    # w1 (resident)
                pl.BlockSpec((1, H), lambda i: (0, 0)),    # b1 (resident)
                pl.BlockSpec((H, Cp), lambda i: (0, 0)),   # w2 (resident)
                pl.BlockSpec((1, Cp), lambda i: (0, 0)),   # b2 (resident)
            ],
            out_specs=pl.BlockSpec((tb, Cp), lambda i: (i, 0)),
        ),
        compiler_params=pltpu.CompilerParams(
            dimension_semantics=("parallel",),
        ),
        cost_estimate=cost,
    )(xb, w1, b1, w2p, b2p)

    # Strip batch / class padding.
    return out_padded[:B, :C]


def reference(x, w1, b1, w2, b2):
    h = jnp.maximum(x @ w1 + b1, 0.0)
    logits = h @ w2 + b2
    return jax.nn.log_softmax(logits, axis=1)


if __name__ == "__main__":
    # Small shapes consistent with the module: n_hidden=32, n_class=4, batch=8.
    B, n_hidden, n_class = 8, 32, 4

    key = jax.random.PRNGKey(0)
    kx, kw1, kb1, kw2, kb2 = jax.random.split(key, 5)

    # Deterministic parameter init (PyTorch-Linear-style uniform bounds).
    bound1 = 1.0 / jnp.sqrt(n_hidden)
    bound2 = 1.0 / jnp.sqrt(n_hidden)
    x = jax.random.normal(kx, (B, n_hidden), dtype=jnp.float32)
    w1 = jax.random.uniform(kw1, (n_hidden, n_hidden), jnp.float32, -bound1, bound1)
    b1 = jax.random.uniform(kb1, (1, n_hidden), jnp.float32, -bound1, bound1)
    w2 = jax.random.uniform(kw2, (n_hidden, n_class), jnp.float32, -bound2, bound2)
    b2 = jax.random.uniform(kb2, (1, n_class), jnp.float32, -bound2, bound2)

    # One-time parameter prep (outside the per-call forward).
    w1p, b1p, w2p, b2p = prepare_params(w1, b1, w2, b2)
    w1p, b1p, w2p, b2p = jax.block_until_ready((w1p, b1p, w2p, b2p))

    out = mlp_classifier(x, w1p, b1p, w2p, b2p, n_class=n_class)
    out = jax.block_until_ready(out)

    ref = reference(x, w1, b1, w2, b2)
    assert out.shape == (B, n_class)
    assert jnp.allclose(out, ref, atol=1e-5, rtol=1e-5), "mismatch vs reference"

    print("KERNEL_OK")
</pallas_src>

<mosaic_0001>
module attributes {stable_mosaic.version = 11 : i64} {
  func.func @_kernel(%arg0: i32, %arg1: memref<8x32xf32, #tpu.memory_space<vmem>>, %arg2: memref<32x32xf32, #tpu.memory_space<vmem>>, %arg3: memref<1x32xf32, #tpu.memory_space<vmem>>, %arg4: memref<32x128xf32, #tpu.memory_space<vmem>>, %arg5: memref<1x128xf32, #tpu.memory_space<vmem>>, %arg6: memref<8x128xf32, #tpu.memory_space<vmem>>) attributes {dimension_semantics = [#tpu.dimension_semantics<parallel>], iteration_bounds = array<i64: 1>, scalar_prefetch = 0 : i64, scratch_operands = 0 : i64, tpu.core_type = #tpu.core_type<tc>, window_params = [{transform_indices = @transform_0, window_bounds = array<i64: 8, 32>}, {pipeline_mode = #tpu.pipeline_mode<synchronous>, transform_indices = @transform_1, window_bounds = array<i64: 32, 32>}, {pipeline_mode = #tpu.pipeline_mode<synchronous>, transform_indices = @transform_2, window_bounds = array<i64: 1, 32>}, {pipeline_mode = #tpu.pipeline_mode<synchronous>, transform_indices = @transform_3, window_bounds = array<i64: 32, 128>}, {pipeline_mode = #tpu.pipeline_mode<synchronous>, transform_indices = @transform_4, window_bounds = array<i64: 1, 128>}, {transform_indices = @transform_5, window_bounds = array<i64: 8, 128>}]} {
    %c0 = arith.constant 0 : index
    %c0_0 = arith.constant 0 : index
    %0 = vector.load %arg1[%c0, %c0_0] : memref<8x32xf32, #tpu.memory_space<vmem>>, vector<8x32xf32>
    %c0_1 = arith.constant 0 : index
    %c0_2 = arith.constant 0 : index
    %1 = vector.load %arg2[%c0_1, %c0_2] : memref<32x32xf32, #tpu.memory_space<vmem>>, vector<32x32xf32>
    %cst = arith.constant dense<0.000000e+00> : vector<8x32xf32>
    %2 = tpu.matmul %0, %1, %cst {dimension_numbers = #tpu.dot_dimension_numbers<[1], [0], [0], [1], [0, 0, 1, 1], [], []>} : vector<8x32xf32>, vector<32x32xf32>, vector<8x32xf32> -> vector<8x32xf32>
    %c0_3 = arith.constant 0 : index
    %c0_4 = arith.constant 0 : index
    %3 = vector.load %arg3[%c0_3, %c0_4] : memref<1x32xf32, #tpu.memory_space<vmem>>, vector<1x32xf32>
    %4 = vector.broadcast %3 : vector<1x32xf32> to vector<8x32xf32>
    %5 = arith.addf %2, %4 : vector<8x32xf32>
    %cst_5 = arith.constant 0.000000e+00 : f32
    %6 = vector.broadcast %cst_5 : f32 to vector<8x32xf32>
    %7 = arith.maximumf %5, %6 : vector<8x32xf32>
    %c0_6 = arith.constant 0 : index
    %c0_7 = arith.constant 0 : index
    %8 = vector.load %arg4[%c0_6, %c0_7] : memref<32x128xf32, #tpu.memory_space<vmem>>, vector<32x128xf32>
    %cst_8 = arith.constant dense<0.000000e+00> : vector<8x128xf32>
    %9 = tpu.matmul %7, %8, %cst_8 {dimension_numbers = #tpu.dot_dimension_numbers<[1], [0], [0], [1], [0, 0, 1, 1], [], []>} : vector<8x32xf32>, vector<32x128xf32>, vector<8x128xf32> -> vector<8x128xf32>
    %c0_9 = arith.constant 0 : index
    %c0_10 = arith.constant 0 : index
    %10 = vector.load %arg5[%c0_9, %c0_10] : memref<1x128xf32, #tpu.memory_space<vmem>>, vector<1x128xf32>
    %11 = vector.broadcast %10 : vector<1x128xf32> to vector<8x128xf32>
    %12 = arith.addf %9, %11 : vector<8x128xf32>
    %cst_11 = arith.constant dense<0xFF800000> : vector<8xf32>
    %13 = vector.multi_reduction <maximumf>, %12, %cst_11 [1] : vector<8x128xf32> to vector<8xf32>
    %14 = vector.shape_cast %13 : vector<8xf32> to vector<8x1xf32>
    %15 = vector.broadcast %14 : vector<8x1xf32> to vector<8x128xf32>
    %16 = arith.subf %12, %15 : vector<8x128xf32>
    %17 = math.exp %16 : vector<8x128xf32>
    %cst_12 = arith.constant dense<0.000000e+00> : vector<8xf32>
    %18 = vector.multi_reduction <add>, %17, %cst_12 [1] : vector<8x128xf32> to vector<8xf32>
    %19 = vector.shape_cast %18 : vector<8xf32> to vector<8x1xf32>
    %20 = math.log %19 : vector<8x1xf32>
    %21 = vector.broadcast %20 : vector<8x1xf32> to vector<8x128xf32>
    %22 = arith.subf %16, %21 : vector<8x128xf32>
    %c0_13 = arith.constant 0 : index
    %c0_14 = arith.constant 0 : index
    %23 = vector.load %arg6[%c0_13, %c0_14] : memref<8x128xf32, #tpu.memory_space<vmem>>, vector<8x128xf32>
    tpu.vector_store %arg6[%c0_13, %c0_14], %22 {strides = array<i32>} : memref<8x128xf32, #tpu.memory_space<vmem>>, vector<8x128xf32>,
    return
  }
  func.func @transform_0(%arg0: i32) -> (i32, i32) {
    %c0_i32 = arith.constant 0 : i32
    %c0_i32_0 = arith.constant 0 : i32
    return %arg0, %c0_i32 : i32, i32
  }
  func.func @transform_1(%arg0: i32) -> (i32, i32) {
    %c0_i32 = arith.constant 0 : i32
    %c0_i32_0 = arith.constant 0 : i32
    %c0_i32_1 = arith.constant 0 : i32
    return %c0_i32, %c0_i32_0 : i32, i32
  }
  func.func @transform_2(%arg0: i32) -> (i32, i32) {
    %c0_i32 = arith.constant 0 : i32
    %c0_i32_0 = arith.constant 0 : i32
    %c0_i32_1 = arith.constant 0 : i32
    return %c0_i32, %c0_i32_0 : i32, i32
  }
  func.func @transform_3(%arg0: i32) -> (i32, i32) {
    %c0_i32 = arith.constant 0 : i32
    %c0_i32_0 = arith.constant 0 : i32
    %c0_i32_1 = arith.constant 0 : i32
    return %c0_i32, %c0_i32_0 : i32, i32
  }
  func.func @transform_4(%arg0: i32) -> (i32, i32) {
    %c0_i32 = arith.constant 0 : i32
    %c0_i32_0 = arith.constant 0 : i32
    %c0_i32_1 = arith.constant 0 : i32
    return %c0_i32, %c0_i32_0 : i32, i32
  }
  func.func @transform_5(%arg0: i32) -> (i32, i32) {
    %c0_i32 = arith.constant 0 : i32
    %c0_i32_0 = arith.constant 0 : i32
    return %arg0, %c0_i32 : i32, i32
  }
}

</mosaic_0001>

<bundles_post_ra>
// kernel: mlp_classifier.1
= control target key start
LH: loop header
LB: loop body
LE: loop exit
PB: predicated region body
PF: predicated region fallthrough
CT: control target
= control target key end

     0   :  { %10 = vsyncpa [#allocation3], 0  ;;  %s466_s0 = inlined_call_operand.hbm [shape: f32[8,32], index: 0, kind: input, shape index: {}]   ;;  %s467_s1 = inlined_call_operand.hbm [shape: f32[32,32], index: 1, kind: input, shape index: {}]   ;;  %s468_s2 = inlined_call_operand.vmem [shape: f32[1,32], index: 2, kind: input, shape index: {}]   ;;  %s469_s3 = inlined_call_operand.hbm [shape: f32[32,128], index: 3, kind: input, shape index: {}]   ;;  %s470_s4 = inlined_call_operand.vmem [shape: f32[1,128], index: 4, kind: input, shape index: {}]   ;;  %s471_s5 = inlined_call_operand.vmem [shape: f32[8,128], index: 5, kind: output, shape index: {}]  }
   0x1   :  { %11 = vsyncpa [#allocation5], 0  ;;  %s377_s18 = smov [#allocation4]   ;;  %s307_s22 = scalar_lea.hbm %s467_s1, 512 }
   0x2   :  { %s27_s19 = sshll.u32 %s377_s18, 4  ;;  %p308_p0 = scmp.ne.s32.totalorder %s467_s1, %s307_s22  ;;  %s28_s19 = int_to_ptr.vmem [resolvable:$true] %s27_s19 }
   0x3   :  { %p311_p1 = scmp.lt.u32.totalorder %s307_s22, %s467_s1 }
   0x5   :  { %p313_p2 = pnand %p311_p1, %p308_p0 }
   0x7   :  { %316 = shalt.err (!%p313_p2)
}
   0x8   :  { %s317_s27 = scalar_lea.vmem %s28_s19, 512  ;;  %p322_p4 = scmp.lt.s32.totalorder %s28_s19, %s28_s19 }
   0x9   :  { %p318_p3 = scmp.ne.s32.totalorder %s28_s19, %s317_s27  ;;  %p323_p5 = scmp.lt.s32.totalorder %s317_s27, %s317_s27 }
   0xb   :  { %p324_p6 = por %p323_p5, %p322_p4 }
   0xd   :  { %p325_p7 = pnand %p324_p6, %p318_p3 }
   0xf   :  { %328 = shalt.err (!%p325_p7)
}
  0x10   :  { %s378_s28 = smov 128   ;;  %s379_s29 = smov 8  }
  0x11   :  { %33 = dma.hbm_to_vmem [thread:$0]  %s467_s1, 512, %s28_s19, [#allocation5], %s378_s28, %s378_s28, %s379_s29  }
  0x12   :  { %s380_s7 = smov [#allocation2]   ;;  %s381_s9 = smov [#allocation6]  }
  0x13   :  { %s18_s8 = sshll.u32 %s380_s7, 4  ;;  %s41_s10 = sshll.u32 %s381_s9, 4  ;;  %s19_s8 = int_to_ptr.vmem [resolvable:$true] %s18_s8  ;;  %s42_s10 = int_to_ptr.vmem [resolvable:$true] %s41_s10 }
  0x14   :  { %s329_s13 = scalar_lea.hbm %s466_s0, 128 }
  0x15   :  { %p330_p8 = scmp.ne.s32.totalorder %s466_s0, %s329_s13  ;;  %p333_p9 = scmp.lt.u32.totalorder %s329_s13, %s466_s0 }
  0x17   :  { %p335_p10 = pnand %p333_p9, %p330_p8 }
  0x19   :  { %338 = shalt.err (!%p335_p10)
}
  0x1a   :  { %s339_s1 = scalar_lea.vmem %s19_s8, 128  ;;  %p344_p12 = scmp.lt.s32.totalorder %s19_s8, %s19_s8 }
  0x1b   :  { %p340_p11 = scmp.ne.s32.totalorder %s19_s8, %s339_s1  ;;  %p345_p13 = scmp.lt.s32.totalorder %s339_s1, %s339_s1 }
  0x1d   :  { %p346_p0 = por %p345_p13, %p344_p12 }
  0x1f   :  { %p347_p1 = pnand %p346_p0, %p340_p11 }
  0x21   :  { %350 = shalt.err (!%p347_p1)
}
  0x22   :  { %21 = dma.hbm_to_vmem [thread:$0]  %s466_s0, 128, %s19_s8, [#allocation3]  }
  0x23   :  { %s351_s22 = scalar_lea.hbm %s469_s3, 512 }
  0x24   :  { %p352_p2 = scmp.ne.s32.totalorder %s469_s3, %s351_s22  ;;  %p355_p3 = scmp.lt.u32.totalorder %s351_s22, %s469_s3 }
  0x26   :  { %p357_p4 = pnand %p355_p3, %p352_p2 }
  0x28   :  { %360 = shalt.err (!%p357_p4)
}
  0x29   :  { %s361_s27 = scalar_lea.vmem %s42_s10, 512  ;;  %p366_p6 = scmp.lt.s32.totalorder %s42_s10, %s42_s10 }
  0x2a   :  { %p362_p5 = scmp.ne.s32.totalorder %s42_s10, %s361_s27  ;;  %p367_p7 = scmp.lt.s32.totalorder %s361_s27, %s361_s27 }
  0x2c   :  { %p368_p8 = por %p367_p7, %p366_p6 }
  0x2e   :  { %p369_p9 = pnand %p368_p8, %p362_p5 }
  0x30   :  { %372 = shalt.err (!%p369_p9)
}
  0x31   :  { %47 = dma.hbm_to_vmem [thread:$0]  %s469_s3, 512, %s42_s10, [#allocation5], %s378_s28, %s378_s28, %s379_s29  }
  0x32   :  { %373 = dma.done.wait [#allocation3], 128  }
  0x33   :  { %374 = vsyncadd [#allocation3], 4294967168 }
  0x34   :  { %375 = dma.done.wait [#allocation5], 1024  }
  0x35   :  { %376 = vsyncadd [#allocation5], 4294966272  ;;  %v382_v0 = vmov 0.0|0.0   ;;  %vm383_vm0 = vmmov 0   ;;  %v384_v1 = vmov 0.0   ;;  %v60_v2 = vld [vmem:[#allocation4] sm:$0xff] }
  0x36   :  { %283 = vmatprep.subr.bf16.mxu0 %v382_v0  ;;  %269 = vmatprep.mubr.msk.f32.mxu0 %vm383_vm0, %v384_v1  ;;  %v61_v3 = vld [vmem:[#allocation4 + $0x8] sm:$0xff]  ;;  %v62_v4 = vld [vmem:[#allocation4 + $0x10] sm:$0xff]  ;;  %v63_v6 = vld [vmem:[#allocation4 + $0x18] sm:$0xff]  ;;  %vm71_vm1 = vcmask 261120  }
  0x37   :  { %289 = vmatprep.subr.bf16.mxu1 %v382_v0  ;;  %280 = vmatprep.mubr.msk.f32.mxu1 %vm383_vm0, %v384_v1  ;;  %v284_v5 = vpack.c.bf16 %v61_v3, %v60_v2  ;;  %v146_v7 = vld [vmem:[#allocation6] sm:$0xff]  ;;  %v147_v8 = vld [vmem:[#allocation6 + $0x8] sm:$0xff]  ;;  %v287_v9 = vpack.c.bf16 %v63_v6, %v62_v4  ;;  %v59_v11 = vld [vmem:[#allocation2] sm:$0xff] }
  0x38   :  { %v290_v10 = vpack.c.bf16 %v147_v8, %v146_v7  ;;  %v148_v12 = vld [vmem:[#allocation6 + $0x10] sm:$0xff]  ;;  %v149_v13 = vld [vmem:[#allocation6 + $0x18] sm:$0xff] }
  0x39   :  { %285 = vmatpush3.bf16.msra.mxu0 %v284_v5  ;;  %v293_v14 = vpack.c.bf16 %v149_v13, %v148_v12  ;;  %v247_v15 = vld [vmem:[%s468_s2] ss:$0 sm:$0xff] }
  0x3a   :  { %286 = vmatprep.subr.bf16.mxu0 %v382_v0  ;;  %291 = vmatpush3.bf16.msra.mxu1 %v290_v10  ;;  %v249_v20 = vld [vmem:[%s470_s4] ss:$0 sm:$0xff] }
  0x3b   :  { %292 = vmatprep.subr.bf16.mxu1 %v382_v0 }
  0x3d   :  { %288 = vmatpush3.bf16.msra.mxu0 %v287_v9 }
  0x3e   :  { %294 = vmatpush3.bf16.msra.mxu1 %v293_v14 }
  0x40   :  { %270 = vmatmul.mubr.msk.f32.vlgmr.msra.gmra.mrb[0].mxu0 %vm71_vm1, %v59_v11 }
 0x113   :  { %v141_v16 = vpop.f32.mrb[0].mxu0 }
 0x114   :  { %v142_v17 = vadd.f32 %v247_v15, %v141_v16  ;;  %v271_v18 = vpop.f32.mrb[1].mxu0 }
 0x116   :  { %v145_v19 = vmax.f32 %v142_v17, 0.0 }
 0x118   :  { %281 = vmatmul.mubr.msk.f32.vlgmr.msra.gmra.mrb[0].mxu1 %vm71_vm1, %v145_v19 }
 0x1eb   :  { %v226_v21 = vpop.f32.mrb[0].mxu1 }
 0x1ec   :  { %v227_v22 = vadd.f32 %v249_v20, %v226_v21  ;;  %v282_v23 = vpop.f32.mrb[1].mxu1 }
 0x1ee   :  { %230 = vmax.xlane.f32.xlu0 %v227_v22 }
 0x27b   :  { %v231_v24 = vpop.xlane.xlu0 %230 }
 0x27c   :  { %v232_v25 = vsub.f32 %v227_v22, %v231_v24 }
 0x27e   :  { %v233_v26 = vmul.f32 1.442695, %v232_v25 }
 0x280   :  { %303 = vpow2.f32 %v233_v26 }
 0x28a   :  { %v304_v27 = vpop.eup %303 }
 0x28b   :  { %235 = vadd.xlane.f32.xlu0 %v304_v27 }
 0x318   :  { %v236_v28 = vpop.xlane.xlu0 %235 }
 0x319   :  { %305 = vlog2.f32 %v236_v28 }
 0x323   :  { %v306_v29 = vpop.eup %305 }
 0x324   :  { %v238_v30 = vmul.f32 0.6931472, %v306_v29 }
 0x326   :  { %v239_v31 = vsub.f32 %v232_v25, %v238_v30 }
 0x328   :  { %240 = vst [vmem:[%s471_s5] sm:$0xff] %v239_v31 }
 0x329   :  { %245 = vsyncpa [#allocation3], 1 }
 0x32a   :  { %246 = vsyncpa [#allocation5], 1 }

</bundles_post_ra>
